<compile_context>
chip_gen: v7x
topology: tpu7x:2x2x1
jax: 0.10.0
libtpu: 0.0.40
codegen_flags: <defaults>
</compile_context>

<pallas_src>
import functools

import jax
import jax.numpy as jnp
import numpy as np
from jax import lax
from jax.experimental import pallas as pl
from jax.experimental.pallas import tpu as pltpu


def _band_matrix(n, k):
    """A[i, j] = 1 if |i - j| <= k // 2 else 0 (stride-1 box filter as matmul)."""
    r = k // 2
    idx = np.arange(n)
    return (np.abs(idx[:, None] - idx[None, :]) <= r).astype(np.float32)


def _simmim_kernel(norm_target, C, H, W,
                   t_ref, r_ref, m_ref, eh_ref, ew_ref, *rest):
    out_ref = rest[-1]

    t = t_ref[...].astype(jnp.float32)    # (C*H, W) stacked channel planes
    r = r_ref[...].astype(jnp.float32)    # (C*H, W)

    if norm_target:
        ah_ref, aw_ref, invc_ref, bes_ref = rest[:4]
        ah = ah_ref[...]                  # (H, H) 0/1 band matrix
        aw = aw_ref[...]                  # (W, W) 0/1 band matrix (symmetric)
        inv_cnt = invc_ref[...]           # (H, W) 1 / valid-element count
        bessel = bes_ref[...]             # (H, W) count / (count - 1)

        # Fused windowed column-sums for all C channels at once (MXU).
        s1_cols = jnp.dot(t, aw, preferred_element_type=jnp.float32)      # (C*H, W)
        s2_cols = jnp.dot(t * t, aw, preferred_element_type=jnp.float32)  # (C*H, W)

    l1_sum = jnp.zeros((H, W), jnp.float32)
    for c in range(C):                    # static channel count -> unrolled
        rows = slice(c * H, (c + 1) * H)
        t_c = t[rows]
        r_c = r[rows]
        if norm_target:
            s1 = jnp.dot(ah, s1_cols[rows], preferred_element_type=jnp.float32)
            s2 = jnp.dot(ah, s2_cols[rows], preferred_element_type=jnp.float32)
            mean = s1 * inv_cnt           # avg_pool2d(count_include_pad=False)
            var = (s2 * inv_cnt - mean * mean) * bessel
            var = jnp.maximum(var, 0.0)
            t_c = (t_c - mean) * lax.rsqrt(var + 1e-6)
        l1_sum = l1_sum + jnp.abs(t_c - r_c)   # L1, summed over channels

    # Pool |t - r| down to patch resolution (tiny MXU matmuls) and weight by
    # the patch-level mask -- the pixel-level mask never exists.
    patch_l1 = jnp.dot(
        jnp.dot(eh_ref[...], l1_sum, preferred_element_type=jnp.float32),
        ew_ref[...], preferred_element_type=jnp.float32)                  # (h, w)
    partial = jnp.sum(patch_l1 * m_ref[...])

    # Per-image partial sum, broadcast across one lane-dense row.
    out_ref[...] = partial * jnp.ones((1, 128), jnp.float32)


def simmim_loss(input_images, reconstructed, mask, *, patch_size=4,
                norm_target=True, norm_target_patch_size=7):
    """Pallas implementation of SimMIMLoss.forward."""
    B, C, H, W = input_images.shape
    h, w = H // patch_size, W // patch_size

    # (B, C, H, W) -> (B, C*H, W): free relabel, lets one grid step stream all
    # channels of an image as one lane/sublane-friendly slab (native dtype).
    t_in = input_images.reshape(B, C * H, W)
    r_in = reconstructed.reshape(B, C * H, W)

    # Patch-level mask stays patch-level (tiny).
    m_in = mask.reshape(B, h, w).astype(jnp.float32)

    # Patch-pooling matrices: eh_t[j, i] = 1 iff i // p == j ; ew[i, j] likewise.
    eh_t = np.zeros((h, H), np.float32)
    eh_t[np.arange(H) // patch_size, np.arange(H)] = 1.0
    ew = np.zeros((W, w), np.float32)
    ew[np.arange(W), np.arange(W) // patch_size] = 1.0

    in_specs = [
        pl.BlockSpec((None, C * H, W), lambda b: (b, 0, 0)),
        pl.BlockSpec((None, C * H, W), lambda b: (b, 0, 0)),
        pl.BlockSpec((None, h, w), lambda b: (b, 0, 0)),
        pl.BlockSpec((h, H), lambda b: (0, 0)),
        pl.BlockSpec((W, w), lambda b: (0, 0)),
    ]
    args = [t_in, r_in, m_in, jnp.asarray(eh_t), jnp.asarray(ew)]

    if norm_target:
        assert norm_target_patch_size % 2 == 1
        k = norm_target_patch_size
        a_h = _band_matrix(H, k)
        a_w = _band_matrix(W, k)
        # Separable valid-element count of the zero-padded stride-1 box filter.
        cnt = np.outer(a_h.sum(axis=1), a_w.sum(axis=0)).astype(np.float32)
        inv_cnt = (1.0 / cnt).astype(np.float32)
        bessel = (cnt / (cnt - 1.0)).astype(np.float32)
        in_specs += [
            pl.BlockSpec((H, H), lambda b: (0, 0)),
            pl.BlockSpec((W, W), lambda b: (0, 0)),
            pl.BlockSpec((H, W), lambda b: (0, 0)),
            pl.BlockSpec((H, W), lambda b: (0, 0)),
        ]
        args += [jnp.asarray(a_h), jnp.asarray(a_w),
                 jnp.asarray(inv_cnt), jnp.asarray(bessel)]

    kernel = functools.partial(_simmim_kernel, norm_target, C, H, W)

    partials = pl.pallas_call(
        kernel,
        out_shape=jax.ShapeDtypeStruct((B, 1, 128), jnp.float32),
        grid_spec=pltpu.PrefetchScalarGridSpec(
            num_scalar_prefetch=0,
            grid=(B,),
            in_specs=in_specs,
            out_specs=pl.BlockSpec((None, 1, 128), lambda b: (b, 0, 0)),
        ),
        # Per-b disjoint outputs -> b axis can be parallel (v7x megacore).
        # VMEM footprint per step is a few hundred KB even at 224x224, so the
        # default scoped VMEM limit is plenty on v5e/v6e/v7x.
        compiler_params=pltpu.CompilerParams(
            dimension_semantics=("parallel",)),
    )(*args)

    numerator = jnp.sum(partials[:, 0, 0])
    mask_sum = jnp.sum(mask.astype(jnp.float32)) * (patch_size * patch_size) * C
    return numerator / (mask_sum + 1e-5) / C


# ---------------- pure-JAX reference (for correctness check only) ----------


def _win_sum(x, k):
    pad = k // 2
    return lax.reduce_window(x, 0.0, lax.add, (1, 1, k, k), (1, 1, 1, 1),
                             [(0, 0), (0, 0), (pad, pad), (pad, pad)])


def simmim_loss_ref(input_images, reconstructed, mask, *, patch_size=4,
                    norm_target=True, k=7):
    B, C, H, W = input_images.shape
    h, w = H // patch_size, W // patch_size
    mask_up = mask.reshape(B, h, w).astype(jnp.float32)
    mask_up = jnp.repeat(jnp.repeat(mask_up, patch_size, axis=1),
                         patch_size, axis=2)
    mask_up = jnp.broadcast_to(mask_up[:, None, :, :], (B, C, H, W))
    t = input_images.astype(jnp.float32)
    if norm_target:
        ones = jnp.ones_like(t)
        s1 = _win_sum(t, k)
        s2 = _win_sum(t * t, k)
        cnt = _win_sum(ones, k)
        mean = s1 / cnt
        var = (s2 / cnt - mean ** 2) * (cnt / (cnt - 1.0))
        var = jnp.maximum(var, 0.0)
        t = (t - mean) / jnp.sqrt(var + 1e-6)
    l1 = jnp.abs(t - reconstructed.astype(jnp.float32))
    return (l1 * mask_up).sum() / (mask_up.sum() + 1e-5) / C


if __name__ == "__main__":
    key = jax.random.PRNGKey(0)
    B, C, H, W = 2, 3, 16, 16
    patch_size = 4
    norm_target_patch_size = 7  # must be odd; default 47 shrunk for small demo
    num_patches = (H // patch_size) * (W // patch_size)

    k1, k2, k3 = jax.random.split(key, 3)
    x = jax.random.normal(k1, (B, C, H, W), jnp.float32)
    recon = jax.random.normal(k2, (B, C, H, W), jnp.float32)
    mask = (jax.random.uniform(k3, (B, num_patches)) > 0.5).astype(jnp.float32)

    # norm_target=True (default SimMIM path)
    loss = simmim_loss(x, recon, mask, patch_size=patch_size,
                       norm_target=True,
                       norm_target_patch_size=norm_target_patch_size)
    loss = jax.block_until_ready(loss)
    ref = simmim_loss_ref(x, recon, mask, patch_size=patch_size,
                          norm_target=True, k=norm_target_patch_size)
    assert np.allclose(np.asarray(loss), np.asarray(ref),
                       rtol=1e-4, atol=1e-5), (float(loss), float(ref))

    # norm_target=False path (conditional in_specs, no band matrices streamed)
    loss2 = simmim_loss(x, recon, mask, patch_size=patch_size,
                        norm_target=False)
    loss2 = jax.block_until_ready(loss2)
    ref2 = simmim_loss_ref(x, recon, mask, patch_size=patch_size,
                           norm_target=False)
    assert np.allclose(np.asarray(loss2), np.asarray(ref2),
                       rtol=1e-4, atol=1e-5), (float(loss2), float(ref2))

    print("KERNEL_OK")
</pallas_src>

<mosaic_0001>
module attributes {stable_mosaic.version = 11 : i64} {
  func.func @_simmim_kernel(%arg0: i32, %arg1: memref<1x48x16xf32, #tpu.memory_space<vmem>>, %arg2: memref<1x48x16xf32, #tpu.memory_space<vmem>>, %arg3: memref<1x4x4xf32, #tpu.memory_space<vmem>>, %arg4: memref<4x16xf32, #tpu.memory_space<vmem>>, %arg5: memref<16x4xf32, #tpu.memory_space<vmem>>, %arg6: memref<16x16xf32, #tpu.memory_space<vmem>>, %arg7: memref<16x16xf32, #tpu.memory_space<vmem>>, %arg8: memref<16x16xf32, #tpu.memory_space<vmem>>, %arg9: memref<16x16xf32, #tpu.memory_space<vmem>>, %arg10: memref<1x1x128xf32, #tpu.memory_space<vmem>>) attributes {dimension_semantics = [#tpu.dimension_semantics<parallel>], iteration_bounds = array<i64: 2>, scalar_prefetch = 0 : i64, scratch_operands = 0 : i64, tpu.core_type = #tpu.core_type<tc>, window_params = [{transform_indices = @transform_0, window_bounds = array<i64: 1, 48, 16>}, {transform_indices = @transform_1, window_bounds = array<i64: 1, 48, 16>}, {transform_indices = @transform_2, window_bounds = array<i64: 1, 4, 4>}, {pipeline_mode = #tpu.pipeline_mode<synchronous>, transform_indices = @transform_3, window_bounds = array<i64: 4, 16>}, {pipeline_mode = #tpu.pipeline_mode<synchronous>, transform_indices = @transform_4, window_bounds = array<i64: 16, 4>}, {pipeline_mode = #tpu.pipeline_mode<synchronous>, transform_indices = @transform_5, window_bounds = array<i64: 16, 16>}, {pipeline_mode = #tpu.pipeline_mode<synchronous>, transform_indices = @transform_6, window_bounds = array<i64: 16, 16>}, {pipeline_mode = #tpu.pipeline_mode<synchronous>, transform_indices = @transform_7, window_bounds = array<i64: 16, 16>}, {pipeline_mode = #tpu.pipeline_mode<synchronous>, transform_indices = @transform_8, window_bounds = array<i64: 16, 16>}, {transform_indices = @transform_9, window_bounds = array<i64: 1, 1, 128>}]} {
    %c0 = arith.constant 0 : index
    %c0_0 = arith.constant 0 : index
    %c0_1 = arith.constant 0 : index
    %0 = vector.load %arg1[%c0, %c0_0, %c0_1] : memref<1x48x16xf32, #tpu.memory_space<vmem>>, vector<1x48x16xf32>
    %1 = vector.shape_cast %0 : vector<1x48x16xf32> to vector<48x16xf32>
    %c0_2 = arith.constant 0 : index
    %c0_3 = arith.constant 0 : index
    %c0_4 = arith.constant 0 : index
    %2 = vector.load %arg2[%c0_2, %c0_3, %c0_4] : memref<1x48x16xf32, #tpu.memory_space<vmem>>, vector<1x48x16xf32>
    %3 = vector.shape_cast %2 : vector<1x48x16xf32> to vector<48x16xf32>
    %c0_5 = arith.constant 0 : index
    %c0_6 = arith.constant 0 : index
    %4 = vector.load %arg6[%c0_5, %c0_6] : memref<16x16xf32, #tpu.memory_space<vmem>>, vector<16x16xf32>
    %c0_7 = arith.constant 0 : index
    %c0_8 = arith.constant 0 : index
    %5 = vector.load %arg7[%c0_7, %c0_8] : memref<16x16xf32, #tpu.memory_space<vmem>>, vector<16x16xf32>
    %c0_9 = arith.constant 0 : index
    %c0_10 = arith.constant 0 : index
    %6 = vector.load %arg8[%c0_9, %c0_10] : memref<16x16xf32, #tpu.memory_space<vmem>>, vector<16x16xf32>
    %c0_11 = arith.constant 0 : index
    %c0_12 = arith.constant 0 : index
    %7 = vector.load %arg9[%c0_11, %c0_12] : memref<16x16xf32, #tpu.memory_space<vmem>>, vector<16x16xf32>
    %cst = arith.constant dense<0.000000e+00> : vector<48x16xf32>
    %8 = tpu.matmul %1, %5, %cst {dimension_numbers = #tpu.dot_dimension_numbers<[1], [0], [0], [1], [0, 0, 1, 1], [], []>} : vector<48x16xf32>, vector<16x16xf32>, vector<48x16xf32> -> vector<48x16xf32>
    %9 = arith.mulf %1, %1 : vector<48x16xf32>
    %cst_13 = arith.constant dense<0.000000e+00> : vector<48x16xf32>
    %10 = tpu.matmul %9, %5, %cst_13 {dimension_numbers = #tpu.dot_dimension_numbers<[1], [0], [0], [1], [0, 0, 1, 1], [], []>} : vector<48x16xf32>, vector<16x16xf32>, vector<48x16xf32> -> vector<48x16xf32>
    %cst_14 = arith.constant 0.000000e+00 : f32
    %11 = vector.broadcast %cst_14 : f32 to vector<16x16xf32>
    %12 = vector.extract_strided_slice %1 {offsets = [0, 0], sizes = [16, 16], strides = [1, 1]} : vector<48x16xf32> to vector<16x16xf32>
    %13 = vector.extract_strided_slice %3 {offsets = [0, 0], sizes = [16, 16], strides = [1, 1]} : vector<48x16xf32> to vector<16x16xf32>
    %14 = vector.extract_strided_slice %8 {offsets = [0, 0], sizes = [16, 16], strides = [1, 1]} : vector<48x16xf32> to vector<16x16xf32>
    %cst_15 = arith.constant dense<0.000000e+00> : vector<16x16xf32>
    %15 = tpu.matmul %4, %14, %cst_15 {dimension_numbers = #tpu.dot_dimension_numbers<[1], [0], [0], [1], [0, 0, 1, 1], [], []>} : vector<16x16xf32>, vector<16x16xf32>, vector<16x16xf32> -> vector<16x16xf32>
    %16 = vector.extract_strided_slice %10 {offsets = [0, 0], sizes = [16, 16], strides = [1, 1]} : vector<48x16xf32> to vector<16x16xf32>
    %cst_16 = arith.constant dense<0.000000e+00> : vector<16x16xf32>
    %17 = tpu.matmul %4, %16, %cst_16 {dimension_numbers = #tpu.dot_dimension_numbers<[1], [0], [0], [1], [0, 0, 1, 1], [], []>} : vector<16x16xf32>, vector<16x16xf32>, vector<16x16xf32> -> vector<16x16xf32>
    %18 = arith.mulf %15, %6 : vector<16x16xf32>
    %19 = arith.mulf %17, %6 : vector<16x16xf32>
    %20 = arith.mulf %18, %18 : vector<16x16xf32>
    %21 = arith.subf %19, %20 : vector<16x16xf32>
    %22 = arith.mulf %21, %7 : vector<16x16xf32>
    %cst_17 = arith.constant 0.000000e+00 : f32
    %23 = vector.broadcast %cst_17 : f32 to vector<16x16xf32>
    %24 = arith.maximumf %22, %23 : vector<16x16xf32>
    %25 = arith.subf %12, %18 : vector<16x16xf32>
    %cst_18 = arith.constant 9.99999997E-7 : f32
    %26 = vector.broadcast %cst_18 : f32 to vector<16x16xf32>
    %27 = arith.addf %24, %26 : vector<16x16xf32>
    %28 = math.rsqrt %27 : vector<16x16xf32>
    %29 = arith.mulf %25, %28 : vector<16x16xf32>
    %30 = arith.subf %29, %13 : vector<16x16xf32>
    %31 = math.absf %30 : vector<16x16xf32>
    %32 = arith.addf %11, %31 : vector<16x16xf32>
    %33 = vector.extract_strided_slice %1 {offsets = [16, 0], sizes = [16, 16], strides = [1, 1]} : vector<48x16xf32> to vector<16x16xf32>
    %34 = vector.extract_strided_slice %3 {offsets = [16, 0], sizes = [16, 16], strides = [1, 1]} : vector<48x16xf32> to vector<16x16xf32>
    %35 = vector.extract_strided_slice %8 {offsets = [16, 0], sizes = [16, 16], strides = [1, 1]} : vector<48x16xf32> to vector<16x16xf32>
    %cst_19 = arith.constant dense<0.000000e+00> : vector<16x16xf32>
    %36 = tpu.matmul %4, %35, %cst_19 {dimension_numbers = #tpu.dot_dimension_numbers<[1], [0], [0], [1], [0, 0, 1, 1], [], []>} : vector<16x16xf32>, vector<16x16xf32>, vector<16x16xf32> -> vector<16x16xf32>
    %37 = vector.extract_strided_slice %10 {offsets = [16, 0], sizes = [16, 16], strides = [1, 1]} : vector<48x16xf32> to vector<16x16xf32>
    %cst_20 = arith.constant dense<0.000000e+00> : vector<16x16xf32>
    %38 = tpu.matmul %4, %37, %cst_20 {dimension_numbers = #tpu.dot_dimension_numbers<[1], [0], [0], [1], [0, 0, 1, 1], [], []>} : vector<16x16xf32>, vector<16x16xf32>, vector<16x16xf32> -> vector<16x16xf32>
    %39 = arith.mulf %36, %6 : vector<16x16xf32>
    %40 = arith.mulf %38, %6 : vector<16x16xf32>
    %41 = arith.mulf %39, %39 : vector<16x16xf32>
    %42 = arith.subf %40, %41 : vector<16x16xf32>
    %43 = arith.mulf %42, %7 : vector<16x16xf32>
    %cst_21 = arith.constant 0.000000e+00 : f32
    %44 = vector.broadcast %cst_21 : f32 to vector<16x16xf32>
    %45 = arith.maximumf %43, %44 : vector<16x16xf32>
    %46 = arith.subf %33, %39 : vector<16x16xf32>
    %cst_22 = arith.constant 9.99999997E-7 : f32
    %47 = vector.broadcast %cst_22 : f32 to vector<16x16xf32>
    %48 = arith.addf %45, %47 : vector<16x16xf32>
    %49 = math.rsqrt %48 : vector<16x16xf32>
    %50 = arith.mulf %46, %49 : vector<16x16xf32>
    %51 = arith.subf %50, %34 : vector<16x16xf32>
    %52 = math.absf %51 : vector<16x16xf32>
    %53 = arith.addf %32, %52 : vector<16x16xf32>
    %54 = vector.extract_strided_slice %1 {offsets = [32, 0], sizes = [16, 16], strides = [1, 1]} : vector<48x16xf32> to vector<16x16xf32>
    %55 = vector.extract_strided_slice %3 {offsets = [32, 0], sizes = [16, 16], strides = [1, 1]} : vector<48x16xf32> to vector<16x16xf32>
    %56 = vector.extract_strided_slice %8 {offsets = [32, 0], sizes = [16, 16], strides = [1, 1]} : vector<48x16xf32> to vector<16x16xf32>
    %cst_23 = arith.constant dense<0.000000e+00> : vector<16x16xf32>
    %57 = tpu.matmul %4, %56, %cst_23 {dimension_numbers = #tpu.dot_dimension_numbers<[1], [0], [0], [1], [0, 0, 1, 1], [], []>} : vector<16x16xf32>, vector<16x16xf32>, vector<16x16xf32> -> vector<16x16xf32>
    %58 = vector.extract_strided_slice %10 {offsets = [32, 0], sizes = [16, 16], strides = [1, 1]} : vector<48x16xf32> to vector<16x16xf32>
    %cst_24 = arith.constant dense<0.000000e+00> : vector<16x16xf32>
    %59 = tpu.matmul %4, %58, %cst_24 {dimension_numbers = #tpu.dot_dimension_numbers<[1], [0], [0], [1], [0, 0, 1, 1], [], []>} : vector<16x16xf32>, vector<16x16xf32>, vector<16x16xf32> -> vector<16x16xf32>
    %60 = arith.mulf %57, %6 : vector<16x16xf32>
    %61 = arith.mulf %59, %6 : vector<16x16xf32>
    %62 = arith.mulf %60, %60 : vector<16x16xf32>
    %63 = arith.subf %61, %62 : vector<16x16xf32>
    %64 = arith.mulf %63, %7 : vector<16x16xf32>
    %cst_25 = arith.constant 0.000000e+00 : f32
    %65 = vector.broadcast %cst_25 : f32 to vector<16x16xf32>
    %66 = arith.maximumf %64, %65 : vector<16x16xf32>
    %67 = arith.subf %54, %60 : vector<16x16xf32>
    %cst_26 = arith.constant 9.99999997E-7 : f32
    %68 = vector.broadcast %cst_26 : f32 to vector<16x16xf32>
    %69 = arith.addf %66, %68 : vector<16x16xf32>
    %70 = math.rsqrt %69 : vector<16x16xf32>
    %71 = arith.mulf %67, %70 : vector<16x16xf32>
    %72 = arith.subf %71, %55 : vector<16x16xf32>
    %73 = math.absf %72 : vector<16x16xf32>
    %74 = arith.addf %53, %73 : vector<16x16xf32>
    %c0_27 = arith.constant 0 : index
    %c0_28 = arith.constant 0 : index
    %75 = vector.load %arg4[%c0_27, %c0_28] : memref<4x16xf32, #tpu.memory_space<vmem>>, vector<4x16xf32>
    %cst_29 = arith.constant dense<0.000000e+00> : vector<4x16xf32>
    %76 = tpu.matmul %75, %74, %cst_29 {dimension_numbers = #tpu.dot_dimension_numbers<[1], [0], [0], [1], [0, 0, 1, 1], [], []>} : vector<4x16xf32>, vector<16x16xf32>, vector<4x16xf32> -> vector<4x16xf32>
    %c0_30 = arith.constant 0 : index
    %c0_31 = arith.constant 0 : index
    %77 = vector.load %arg5[%c0_30, %c0_31] : memref<16x4xf32, #tpu.memory_space<vmem>>, vector<16x4xf32>
    %cst_32 = arith.constant dense<0.000000e+00> : vector<4x4xf32>
    %78 = tpu.matmul %76, %77, %cst_32 {dimension_numbers = #tpu.dot_dimension_numbers<[1], [0], [0], [1], [0, 0, 1, 1], [], []>} : vector<4x16xf32>, vector<16x4xf32>, vector<4x4xf32> -> vector<4x4xf32>
    %c0_33 = arith.constant 0 : index
    %c0_34 = arith.constant 0 : index
    %c0_35 = arith.constant 0 : index
    %79 = vector.load %arg3[%c0_33, %c0_34, %c0_35] : memref<1x4x4xf32, #tpu.memory_space<vmem>>, vector<1x4x4xf32>
    %80 = vector.shape_cast %79 : vector<1x4x4xf32> to vector<4x4xf32>
    %81 = arith.mulf %78, %80 : vector<4x4xf32>
    %82 = vector.shape_cast %81 : vector<4x4xf32> to vector<1x4x4xf32>
    %cst_36 = arith.constant dense<0.000000e+00> : vector<1xf32>
    %83 = vector.multi_reduction <add>, %82, %cst_36 [1, 2] : vector<1x4x4xf32> to vector<1xf32>
    %84 = vector.shape_cast %83 : vector<1xf32> to vector<1x1x1xf32>
    %85 = vector.extract %84[0, 0, 0] : f32 from vector<1x1x1xf32>
    %cst_37 = arith.constant 1.000000e+00 : f32
    %86 = vector.broadcast %cst_37 : f32 to vector<1x128xf32>
    %87 = vector.broadcast %85 : f32 to vector<1x128xf32>
    %88 = arith.mulf %87, %86 : vector<1x128xf32>
    %c0_38 = arith.constant 0 : index
    %c0_39 = arith.constant 0 : index
    %c0_40 = arith.constant 0 : index
    %89 = vector.load %arg10[%c0_38, %c0_39, %c0_40] : memref<1x1x128xf32, #tpu.memory_space<vmem>>, vector<1x1x128xf32>
    %90 = vector.shape_cast %89 : vector<1x1x128xf32> to vector<1x128xf32>
    %91 = vector.shape_cast %88 : vector<1x128xf32> to vector<1x1x128xf32>
    tpu.vector_store %arg10[%c0_38, %c0_39, %c0_40], %91 {strides = array<i32>} : memref<1x1x128xf32, #tpu.memory_space<vmem>>, vector<1x1x128xf32>,
    return
  }
  func.func @transform_0(%arg0: i32) -> (i32, i32, i32) {
    %c0_i32 = arith.constant 0 : i32
    %c0_i32_0 = arith.constant 0 : i32
    %c0_i32_1 = arith.constant 0 : i32
    return %arg0, %c0_i32, %c0_i32_0 : i32, i32, i32
  }
  func.func @transform_1(%arg0: i32) -> (i32, i32, i32) {
    %c0_i32 = arith.constant 0 : i32
    %c0_i32_0 = arith.constant 0 : i32
    %c0_i32_1 = arith.constant 0 : i32
    return %arg0, %c0_i32, %c0_i32_0 : i32, i32, i32
  }
  func.func @transform_2(%arg0: i32) -> (i32, i32, i32) {
    %c0_i32 = arith.constant 0 : i32
    %c0_i32_0 = arith.constant 0 : i32
    %c0_i32_1 = arith.constant 0 : i32
    return %arg0, %c0_i32, %c0_i32_0 : i32, i32, i32
  }
  func.func @transform_3(%arg0: i32) -> (i32, i32) {
    %c0_i32 = arith.constant 0 : i32
    %c0_i32_0 = arith.constant 0 : i32
    %c0_i32_1 = arith.constant 0 : i32
    return %c0_i32, %c0_i32_0 : i32, i32
  }
  func.func @transform_4(%arg0: i32) -> (i32, i32) {
    %c0_i32 = arith.constant 0 : i32
    %c0_i32_0 = arith.constant 0 : i32
    %c0_i32_1 = arith.constant 0 : i32
    return %c0_i32, %c0_i32_0 : i32, i32
  }
  func.func @transform_5(%arg0: i32) -> (i32, i32) {
    %c0_i32 = arith.constant 0 : i32
    %c0_i32_0 = arith.constant 0 : i32
    %c0_i32_1 = arith.constant 0 : i32
    return %c0_i32, %c0_i32_0 : i32, i32
  }
  func.func @transform_6(%arg0: i32) -> (i32, i32) {
    %c0_i32 = arith.constant 0 : i32
    %c0_i32_0 = arith.constant 0 : i32
    %c0_i32_1 = arith.constant 0 : i32
    return %c0_i32, %c0_i32_0 : i32, i32
  }
  func.func @transform_7(%arg0: i32) -> (i32, i32) {
    %c0_i32 = arith.constant 0 : i32
    %c0_i32_0 = arith.constant 0 : i32
    %c0_i32_1 = arith.constant 0 : i32
    return %c0_i32, %c0_i32_0 : i32, i32
  }
  func.func @transform_8(%arg0: i32) -> (i32, i32) {
    %c0_i32 = arith.constant 0 : i32
    %c0_i32_0 = arith.constant 0 : i32
    %c0_i32_1 = arith.constant 0 : i32
    return %c0_i32, %c0_i32_0 : i32, i32
  }
  func.func @transform_9(%arg0: i32) -> (i32, i32, i32) {
    %c0_i32 = arith.constant 0 : i32
    %c0_i32_0 = arith.constant 0 : i32
    %c0_i32_1 = arith.constant 0 : i32
    return %arg0, %c0_i32, %c0_i32_0 : i32, i32, i32
  }
}

</mosaic_0001>

<bundles_post_ra>
// kernel: tpu_custom_call.1
= control target key start
LH: loop header
LB: loop body
LE: loop exit
PB: predicated region body
PF: predicated region fallthrough
CT: control target
= control target key end

     0   :  { %14 = vsyncpa [#allocation3], 0  ;;  %s2034_s0 = inlined_call_operand.vmem [shape: f32[2,48,16], index: 0, kind: input, shape index: {}]   ;;  %s2035_s1 = inlined_call_operand.vmem [shape: f32[2,48,16], index: 1, kind: input, shape index: {}]   ;;  %s2036_s2 = inlined_call_operand.vmem [shape: f32[2,4,4], index: 2, kind: input, shape index: {}]   ;;  %s2037_s3 = inlined_call_operand.vmem [shape: f32[4,16], index: 3, kind: input, shape index: {}]   ;;  %s2038_s4 = inlined_call_operand.vmem [shape: f32[16,4], index: 4, kind: input, shape index: {}]   ;;  %s2039_s5 = inlined_call_operand.vmem [shape: f32[16,16], index: 5, kind: input, shape index: {}]   ;;  %s2040_s6 = inlined_call_operand.vmem [shape: f32[16,16], index: 6, kind: input, shape index: {}]   ;;  %s2041_s7 = inlined_call_operand.vmem [shape: f32[16,16], index: 7, kind: input, shape index: {}]   ;;  %s2042_s8 = inlined_call_operand.vmem [shape: f32[16,16], index: 8, kind: input, shape index: {}]   ;;  %s2043_s9 = inlined_call_operand.hbm [shape: f32[2,1,128], index: 9, kind: output, shape index: {}]  }
   0x1   :  { %16 = vsyncpa [#allocation3 + $0x1], 0  ;;  %s1787_s30 = smov 0   ;;  %s1789_s10 = smov 0  }
   0x2   :  { %s1791_s11 = smov 0   ;;  %s1793_s12 = smov 0  }
   0x3 LB: > { %s1808_s13 = sadd.s32 4294967295, %s1731_s12   ;;  %s1410_s14 = sadd.s32 4294967294, %s1731_s12   ;;  %s1731_s12 = sphi %s1793_s12, %s2049_s12   ;;  %s1727_s11 = sphi %s1791_s11, %s2048_s11   ;;  %s1723_s10 = sphi %s1789_s10, %s2047_s10   ;;  %s1719_s30 = sphi %s1787_s30, %s2046_s30  }
   0x4   : > { %s1812_s15 = sadd.s32 1, %s1731_s12   ;;  %s233_s16 = sadd.s32 1, %s1727_s11 }
   0x5   : > { %s230_s17 = ssub.s32 %s1731_s12, %s1812_s15  ;;  %p243_p0 = scmp.ne.s32.totalorder %s1727_s11, %s1723_s10 }
   0x6   : > { %p231_p1 = scmp.eq.s32.totalorder %s230_s17, 0  ;;  %p244_p2 = scmp.eq.s32.totalorder %s1808_s13, 1 }
   0x7   : > { %p249_p3 = scmp.ne.s32.totalorder %s1723_s10, %s1719_s30  ;;  %p250_p4 = scmp.eq.s32.totalorder %s1410_s14, 1 }
   0x8   : > { %s1823_s18 = scalar_select %p231_p1, %s1727_s11, %s233_s16  }
   0x9   : > { %p1825_p5 = por %p244_p2, %p243_p0  ;;  %p1829_p6 = por %p250_p4, %p249_p3 }
   0xa   : > { %p1413_p7 = scmp.ge.s32.totalorder %s1731_s12, 1  ;;  %p309_p8 = scmp.lt.s32.totalorder %s1731_s12, 3 }
   0xc   : > { %p310_p9 = pnand %p1413_p7, %p309_p8 }
   0xd   : > { %v381_v0 = vld [vmem:[%s2040_s6] sm:$0xff] (!%p310_p9)  ;;  %v382_v1 = vld [vmem:[%s2040_s6 + $0x8] sm:$0xff] (!%p310_p9)  ;;  %p353_p10 = scmp.lt.s32.totalorder (!%p310_p9), %s1808_s13, 1  ;;  %vm387_vm0 = vcmask (!%p310_p9), 130048   ;;  %v1733_v35 = vmov (!%p310_p9), 0.0|0.0   ;;  %vm1734_vm1 = vmmov (!%p310_p9), 0  }
   0xe   : > { %313 = sbr.rel (%p310_p9) target bundleno = 1150 (0x47e), region = 56  ;;  %v1574_v2 = vpack.c.bf16 (!%p310_p9), %v382_v1, %v381_v0  ;;  %v379_v15 = vld [vmem:[%s2039_s5] sm:$0xff] (!%p310_p9)  ;;  %v380_v24 = vld [vmem:[%s2039_s5 + $0x8] sm:$0xff] (!%p310_p9)  ;;  %v1735_v36 = vmov (!%p310_p9), 0.0   ;;  %vm1305_vm2 = vcmask (!%p310_p9), 27648   ;;  %s1443_s24 = sshll.u32 (!%p310_p9), %s1808_s13, 4 }
   0xf   : > { %v1228_v37 = vld [vmem:[%s2038_s4] sm:$0xff] (!%p310_p9)  ;;  %v1229_v38 = vld [vmem:[%s2038_s4 + $0x8] sm:$0xff] (!%p310_p9) }
  0x10   : > { %1575 = vmatprep.subr.bf16.mxu0 (!%p310_p9), %v1574_v2  ;;  %1579 = vmatprep.subr.bf16.mxu1 (!%p310_p9), %v1574_v2  ;;  %v1610_v39 = vpack.c.bf16 (!%p310_p9), %v1229_v38, %v1228_v37  ;;  %v384_v40 = vld [vmem:[%s2041_s7 + $0x8] sm:$0xff] (!%p310_p9)  ;;  %v383_v41 = vld [vmem:[%s2041_s7] sm:$0xff] (!%p310_p9) }
  0x11   : > { %1577 = vmatpush3.bf16.msra.mxu0 (!%p310_p9), %v1574_v2  ;;  %1581 = vmatpush3.bf16.msra.mxu1 (!%p310_p9), %v1574_v2  ;;  %v386_v51 = vld [vmem:[%s2042_s8 + $0x8] sm:$0xff] (!%p310_p9)  ;;  %v385_v55 = vld [vmem:[%s2042_s8] sm:$0xff] (!%p310_p9) }
  0x15   : > { %s1843_s25 = scalar_select %p353_p10, %s1808_s13, 1 }
  0x16   : > { %s1736_s13 = smov [#allocation2]  }
  0x17   : > { %s1612_s26 = smul.u32 48, %s1843_s25  ;;  %s1416_s14 = sshll.u32 %s1843_s25, 2 }
  0x18   : > { %s366_s21 = scalar_lea.vmem %s2036_s2, %s1416_s14  ;;  %s351_s25 = sand.u32 1, %s1723_s10  }
  0x19   : > { %s357_s29 = scalar_lea.vmem %s2034_s0, %s1612_s26  ;;  %s1958_s28 = scalar_lea.vmem %s2035_s1, %s1612_s26 }
  0x1a   : > { %v1851_v3 = vld [vmem:[%s357_s29] sm:$0xff]  ;;  %v1853_v4 = vld [vmem:[%s357_s29 + $0x8] sm:$0xff]  ;;  %v1855_v5 = vld [vmem:[%s357_s29 + $0x10] sm:$0xff]  ;;  %s352_s22 = scalar_lea.vmem [#allocation2], %s351_s25  ;;  %s1319_s14 = scalar_lea.sflag [#allocation3], %s351_s25 }
  0x1b   : > { %1496 = vmatprep.mubr.msk.f32.mxu0 %vm387_vm0, %v1851_v3  ;;  %v502_v6 = vmul.f32 %v1853_v4, %v1853_v4  ;;  %v501_v7 = vmul.f32 %v1851_v3, %v1851_v3  ;;  %v503_v8 = vmul.f32 %v1855_v5, %v1855_v5  ;;  %v1865_v9 = vld [vmem:[%s357_s29 + $0x18] sm:$0xff]  ;;  %v1869_v10 = vld [vmem:[%s357_s29 + $0x20] sm:$0xff]  ;;  %v1880_v13 = vld [vmem:[%s357_s29 + $0x28] sm:$0xff]  ;;  %s1331_s23 = sshll.u32 %s352_s22, 4  ;;  %s1994_s29 = scalar_lea.hbm %s2043_s9, %s1443_s24  ;;  %s1989_s23 = int_to_ptr.vmem [resolvable:$true] %s1331_s23 }
  0x1c   : > { %1497 = vmatmul.mubr.msk.f32.vlgmr.msra.gmra.mrb[0].mxu0 %vm387_vm0, %v1853_v4  ;;  %v504_v11 = vmul.f32 %v1865_v9, %v1865_v9  ;;  %v505_v12 = vmul.f32 %v1869_v10, %v1869_v10  ;;  %v506_v14 = vmul.f32 %v1880_v13, %v1880_v13  ;;  %s1669_s16 = scalar_lea.vmem %s1989_s23, 16  ;;  %s1673_s17 = sshll.u32 %s1736_s13, 4  ;;  %s1674_s17 = int_to_ptr.vmem [resolvable:$false] %s1673_s17 }
  0x1d   : > { %1509 = vmatprep.mubr.msk.f32.mxu1 %vm387_vm0, %v501_v7  ;;  %1499 = vmatprep.mubr.msk.f32.mxu0 %vm387_vm0, %v1855_v5  ;;  %p1670_p11 = scmp.ne.s32.totalorder %s1989_s23, %s1669_s16  ;;  %p1676_p0 = scmp.lt.s32.totalorder %s1989_s23, %s1674_s17 }
  0x1e   : > { %1510 = vmatmul.mubr.msk.f32.vlgmr.msra.gmra.mrb[0].mxu1 %vm387_vm0, %v502_v6 }
  0x1f   : > { %1512 = vmatprep.mubr.msk.f32.mxu1 %vm387_vm0, %v503_v8  ;;  %p1671_p12 = pnand %p1670_p11, %p1825_p5 }
  0x20   : > { %1500 = vmatmul.mubr.msk.f32.gmra.mrb[2].mxu0 %vm387_vm0, %v1865_v9 }
  0x21   : > { %1502 = vmatprep.mubr.msk.f32.mxu0 %vm387_vm0, %v1869_v10  ;;  %p1672_p13 = pneg %p1671_p12 }
  0x22   : > { %1513 = vmatmul.mubr.msk.f32.gmra.mrb[2].mxu1 %vm387_vm0, %v504_v11 }
  0x23   : > { %1515 = vmatprep.mubr.msk.f32.mxu1 %vm387_vm0, %v505_v12 }
  0x24   : > { %1503 = vmatmul.mubr.msk.f32.gmra.mrb[4].mxu0 %vm387_vm0, %v1880_v13 }
  0x25   : > { %1522 = vmatprep.mubr.msk.f32.mxu0 %vm387_vm0, %v379_v15 }
  0x26   : > { %1516 = vmatmul.mubr.msk.f32.gmra.mrb[4].mxu1 %vm387_vm0, %v506_v14 }
  0x27   : > { %1529 = vmatprep.mubr.msk.f32.mxu1 %vm387_vm0, %v379_v15 }
  0xef   : > { %v1498_v16 = vpop.f32.mrb[0].mxu0 }
  0xf0   : > { %v472_v17 = vpop.f32.mrb[1].mxu0 }
  0xf1   : > { %v1582_v18 = vpack.c.bf16 %v1498_v16, %v472_v17  ;;  %v1511_v19 = vpop.f32.mrb[0].mxu1 }
  0xf2   : > { %v591_v20 = vpop.f32.mrb[1].mxu1 }
  0xf3   : > { %v1586_v21 = vpack.c.bf16 %v1511_v19, %v591_v20  ;;  %v1501_v22 = vpop.f32.mrb[2].mxu0  ;;  %1583 = vmatprep.subr.bf16.mxu0 %v1582_v18 }
  0xf4   : > { %v482_v23 = vpop.f32.mrb[3].mxu0  ;;  %1585 = vmatpush3.bf16.msra.mxu0 %v1582_v18 }
  0xf5   : > { %v1590_v25 = vpack.c.bf16 %v1501_v22, %v482_v23  ;;  %v1514_v26 = vpop.f32.mrb[2].mxu1  ;;  %1587 = vmatprep.subr.bf16.mxu1 %v1586_v21 }
  0xf6   : > { %v601_v27 = vpop.f32.mrb[3].mxu1  ;;  %1589 = vmatpush3.bf16.msra.mxu1 %v1586_v21 }
  0xf7   : > { %v1594_v28 = vpack.c.bf16 %v1514_v26, %v601_v27  ;;  %v1504_v29 = vpop.f32.mrb[4].mxu0  ;;  %1523 = vmatmul.mubr.msk.f32.vlgmr.msra.gmra.mrb[6].mxu0 %vm387_vm0, %v380_v24  ;;  %1591 = vmatprep.subr.bf16.mxu0 %v1590_v25 }
  0xf8   : > { %v492_v30 = vpop.f32.mrb[5].mxu0  ;;  %1593 = vmatpush3.bf16.msra.mxu0 %v1590_v25  ;;  %1536 = vmatprep.mubr.msk.f32.mxu0 %vm387_vm0, %v379_v15 }
  0xf9   : > { %v1598_v31 = vpack.c.bf16 %v1504_v29, %v492_v30  ;;  %v1517_v32 = vpop.f32.mrb[4].mxu1  ;;  %1530 = vmatmul.mubr.msk.f32.vlgmr.msra.gmra.mrb[6].mxu1 %vm387_vm0, %v380_v24  ;;  %1595 = vmatprep.subr.bf16.mxu1 %v1594_v28 }
  0xfa   : > { %v611_v33 = vpop.f32.mrb[5].mxu1  ;;  %1597 = vmatpush3.bf16.msra.mxu1 %v1594_v28  ;;  %1543 = vmatprep.mubr.msk.f32.mxu1 %vm387_vm0, %v379_v15 }
  0xfb   : > { %v1602_v34 = vpack.c.bf16 %v1517_v32, %v611_v33  ;;  %1537 = vmatmul.mubr.msk.f32.vlgmr.msra.gmra.mrb[8].mxu0 %vm387_vm0, %v380_v24  ;;  %1599 = vmatprep.subr.bf16.mxu0 %v1598_v31 }
  0xfc   : > { %1601 = vmatpush3.bf16.msra.mxu0 %v1598_v31  ;;  %1550 = vmatprep.mubr.msk.f32.mxu0 %vm387_vm0, %v379_v15 }
  0xfd   : > { %1544 = vmatmul.mubr.msk.f32.vlgmr.msra.gmra.mrb[8].mxu1 %vm387_vm0, %v380_v24  ;;  %1603 = vmatprep.subr.bf16.mxu1 %v1602_v34 }
  0xfe   : > { %1605 = vmatpush3.bf16.msra.mxu1 %v1602_v34  ;;  %1557 = vmatprep.mubr.msk.f32.mxu1 %vm387_vm0, %v379_v15 }
  0xff   : > { %1551 = vmatmul.mubr.msk.f32.vlgmr.msra.gmra.mrb[10].mxu0 %vm387_vm0, %v380_v24  ;;  %1606 = vmatprep.subr.bf16.mxu0 %v1733_v35 }
 0x100   : > { %1609 = vmatprep.subr.bf16.mxu1 %v1733_v35  ;;  %1564 = vmatprep.mubr.msk.f32.mxu0 %vm1734_vm1, %v1735_v36 }
 0x101   : > { %1558 = vmatmul.mubr.msk.f32.vlgmr.msra.gmra.mrb[10].mxu1 %vm387_vm0, %v380_v24 }
 0x102   : > { %1571 = vmatprep.mubr.msk.f32.mxu1 %vm1734_vm1, %v1735_v36  ;;  %1611 = vmatpush3.bf16.msra.mxu1 %v1610_v39 }
 0x1ca   : > { %v1524_v42 = vpop.f32.mrb[6].mxu0 }
 0x1cb   : > { %v1923_v43 = vmul.f32 %v1524_v42, %v384_v40  ;;  %v692_v44 = vpop.f32.mrb[7].mxu0 }
 0x1cc   : > { %v1925_v45 = vmul.f32 %v692_v44, %v383_v41  ;;  %v1531_v46 = vpop.f32.mrb[6].mxu1  ;;  %v374_v44 = vld [vmem:[%s1958_s28 + $0x8] sm:$0xff] }
 0x1cd   : > { %v781_v47 = vmul.f32 %v1923_v43, %v1923_v43  ;;  %v779_v48 = vmul.f32 %v1531_v46, %v384_v40  ;;  %v767_v49 = vpop.f32.mrb[7].mxu1 }
 0x1ce   : > { %v780_v50 = vmul.f32 %v1925_v45, %v1925_v45  ;;  %v778_v52 = vmul.f32 %v767_v49, %v383_v41  ;;  %v1538_v53 = vpop.f32.mrb[8].mxu0  ;;  %v788_v42 = vsub.f32 %v1851_v3, %v1925_v45  ;;  %v375_v45 = vld [vmem:[%s1958_s28 + $0x10] sm:$0xff] }
 0x1cf   : > { %v783_v54 = vsub.f32 %v779_v48, %v781_v47  ;;  %v1937_v56 = vmul.f32 %v1538_v53, %v384_v40  ;;  %v868_v57 = vpop.f32.mrb[9].mxu0  ;;  %v373_v47 = vld [vmem:[%s1958_s28] sm:$0xff] }
 0x1d0   : > { %v782_v58 = vsub.f32 %v778_v52, %v780_v50  ;;  %v1939_v59 = vmul.f32 %v868_v57, %v383_v41  ;;  %v1545_v60 = vpop.f32.mrb[8].mxu1 }
 0x1d1   : > { %v785_v61 = vmul.f32 %v783_v54, %v386_v51  ;;  %v957_v62 = vmul.f32 %v1937_v56, %v1937_v56  ;;  %v955_v63 = vmul.f32 %v1545_v60, %v384_v40  ;;  %v943_v0 = vpop.f32.mrb[9].mxu1  ;;  %v965_v50 = vsub.f32 %v1865_v9, %v1937_v56 }
 0x1d2   : > { %v784_v1 = vmul.f32 %v782_v58, %v385_v55  ;;  %v956_v2 = vmul.f32 %v1939_v59, %v1939_v59  ;;  %v954_v6 = vmul.f32 %v943_v0, %v383_v41  ;;  %v1552_v7 = vpop.f32.mrb[10].mxu0 }
 0x1d3   : > { %v787_v8 = vmax.f32 %v785_v61, 0.0  ;;  %v959_v11 = vsub.f32 %v955_v63, %v957_v62  ;;  %v1945_v12 = vmul.f32 %v1552_v7, %v384_v40  ;;  %v1044_v14 = vpop.f32.mrb[11].mxu0  ;;  %v378_v63 = vld [vmem:[%s1958_s28 + $0x28] sm:$0xff] }
 0x1d4   : > { %v786_v15 = vmax.f32 %v784_v1, 0.0  ;;  %v958_v16 = vsub.f32 %v954_v6, %v956_v2  ;;  %v1947_v17 = vmul.f32 %v1044_v14, %v383_v41  ;;  %v1559_v18 = vpop.f32.mrb[10].mxu1  ;;  %v377_v1 = vld [vmem:[%s1958_s28 + $0x20] sm:$0xff] }
 0x1d5   : > { %v791_v19 = vadd.f32 1e-06, %v787_v8  ;;  %v961_v20 = vmul.f32 %v959_v11, %v386_v51  ;;  %v1133_v21 = vmul.f32 %v1945_v12, %v1945_v12  ;;  %v1119_v22 = vpop.f32.mrb[11].mxu1  ;;  %v1131_v27 = vmul.f32 %v1559_v18, %v384_v40 }
 0x1d6   : > { %v790_v23 = vadd.f32 1e-06, %v786_v15  ;;  %v960_v24 = vmul.f32 %v958_v16, %v385_v55  ;;  %v1132_v25 = vmul.f32 %v1947_v17, %v1947_v17  ;;  %v1130_v28 = vmul.f32 %v1119_v22, %v383_v41 }
 0x1d7   : > { %1657 = vrsqrt.f32 %v791_v19  ;;  %v963_v26 = vmax.f32 %v961_v20, 0.0  ;;  %v1135_v31 = vsub.f32 %v1131_v27, %v1133_v21  ;;  %v789_v40 = vsub.f32 %v1853_v4, %v1923_v43  ;;  %v376_v43 = vld [vmem:[%s1958_s28 + $0x18] sm:$0xff]  ;;  %v1303_v20 = vld [vmem:[%s366_s21] sm:$0xf]  ;;  %s1675_s21 = scalar_lea.vmem %s1674_s17, 32 }
 0x1d8   : > { %1659 = vrsqrt.f32 %v790_v23  ;;  %v962_v29 = vmax.f32 %v960_v24, 0.0  ;;  %v1134_v32 = vsub.f32 %v1130_v28, %v1132_v25  ;;  %v964_v4 = vsub.f32 %v1855_v5, %v1939_v59  ;;  %p1677_p1 = scmp.lt.s32.totalorder %s1675_s21, %s1669_s16 }
 0x1d9   : > { %v967_v30 = vadd.f32 1e-06, %v963_v26  ;;  %v1137_v34 = vmul.f32 %v1135_v31, %v386_v51  ;;  %v1141_v60 = vsub.f32 %v1880_v13, %v1945_v12  ;;  %v1140_v62 = vsub.f32 %v1869_v10, %v1947_v17  ;;  %v1154_v10 = vld [vmem:[%s2037_s3] sm:$0xf] }
 0x1da   : > { %v966_v33 = vadd.f32 1e-06, %v962_v29  ;;  %v1136_v35 = vmul.f32 %v1134_v32, %v385_v55  ;;  %p1678_p2 = por %p1677_p1, %p1676_p0 }
 0x1db   : > { %1661 = vrsqrt.f32 %v967_v30  ;;  %v1139_v36 = vmax.f32 %v1137_v34, 0.0 }
 0x1dc   : > { %1663 = vrsqrt.f32 %v966_v33  ;;  %v1138_v37 = vmax.f32 %v1136_v35, 0.0  ;;  %p1679_p3 = pnand %p1678_p2, %p1672_p13 }
 0x1dd   : > { %v1143_v38 = vadd.f32 1e-06, %v1139_v36 }
 0x1de   : > { %v1142_v39 = vadd.f32 1e-06, %v1138_v37 }
 0x1df   : > { %1665 = vrsqrt.f32 %v1143_v38 }
 0x1e0   : > { %1667 = vrsqrt.f32 %v1142_v39 }
 0x1e1   : > { %v1658_v41 = vpop.eup %1657 }
 0x1e2   : > { %v1660_v46 = vpop.eup %1659  ;;  %v795_v48 = vmul.f32 %v1658_v41, %v789_v40 }
 0x1e3   : > { %v794_v49 = vmul.f32 %v1660_v46, %v788_v42 }
 0x1e4   : > { %v797_v51 = vsub.f32 %v795_v48, %v374_v44 }
 0x1e5   : > { %v1662_v52 = vpop.eup %1661  ;;  %v796_v53 = vsub.f32 %v794_v49, %v373_v47 }
 0x1e6   : > { %v1664_v3 = vpop.eup %1663  ;;  %v971_v54 = vmul.f32 %v1662_v52, %v965_v50  ;;  %v799_v61 = vand.u32 2147483647, %v797_v51 }
 0x1e7   : > { %v970_v55 = vmul.f32 %v1664_v3, %v964_v4  ;;  %v798_v5 = vand.u32 2147483647, %v796_v53 }
 0x1e8   : > { %v973_v57 = vsub.f32 %v971_v54, %v376_v43 }
 0x1e9   : > { %v972_v58 = vsub.f32 %v970_v55, %v375_v45  ;;  %v1666_v56 = vpop.eup %1665 }
 0x1ea   : > { %v975_v9 = vand.u32 2147483647, %v973_v57  ;;  %v1668_v0 = vpop.eup %1667  ;;  %v1147_v6 = vmul.f32 %v1666_v56, %v1141_v60 }
 0x1eb   : > { %v974_v59 = vand.u32 2147483647, %v972_v58  ;;  %v1146_v8 = vmul.f32 %v1668_v0, %v1140_v62 }
 0x1ec   : > { %v977_v2 = vadd.f32 %v975_v9, %v799_v61  ;;  %v1149_v11 = vsub.f32 %v1147_v6, %v378_v63 }
 0x1ed   : > { %v976_v7 = vadd.f32 %v974_v59, %v798_v5  ;;  %v1148_v14 = vsub.f32 %v1146_v8, %v377_v1 }
 0x1ee   : > { %v1151_v15 = vand.u32 2147483647, %v1149_v11 }
 0x1ef   : > { %v1150_v13 = vand.u32 2147483647, %v1148_v14 }
 0x1f0   : > { %v1153_v12 = vadd.f32 %v1151_v15, %v977_v2 }
 0x1f1   : > { %v1152_v16 = vadd.f32 %v1150_v13, %v976_v7 }
 0x1f3   : > { %v1607_v18 = vpack.c.bf16 %v1153_v12, %v1152_v16 }
 0x1f5   : > { %1608 = vmatpush3.bf16.msra.mxu0 %v1607_v18 }
 0x1f8   : > { %1565 = vmatmul.mubr.msk.f32.vlgmr.msra.gmra.mrb[12].mxu0 %vm387_vm0, %v1154_v10 }
 0x2cb   : > { %v1224_v17 = vpop.f32.mrb[12].mxu0 }
 0x2cc   : > { %1572 = vmatmul.mubr.msk.f32.vlgmr.msra.gmra.mrb[12].mxu1 %vm387_vm0, %v1224_v17  ;;  %v1566_v19 = vpop.f32.mrb[13].mxu0 }
 0x39f   : > { %v1299_v21 = vpop.f32.mrb[12].mxu1 }
 0x3a0   : > { %v1304_v22 = vmul.f32 %v1303_v20, %v1299_v21  ;;  %v1573_v23 = vpop.f32.mrb[13].mxu1 }
 0x3a2   : > { %v1306_v24 = vsel %vm1305_vm2, %v1304_v22, 0.0 }
 0x3a3   : > { %1307 = vadd.xlane.f32.xlu0 %v1306_v24 }
 0x430   : > { %v1308_v25 = vpop.xlane.xlu0 %1307 }
 0x431   : > { %v1309_v26 = vrot.slane %v1308_v25, 4 }
 0x433   : > { %v1310_v27 = vadd.f32 %v1309_v26, %v1308_v25 }
 0x435   : > { %v1311_v28 = vrot.slane %v1310_v27, 2 }
 0x437   : > { %v1312_v29 = vadd.f32 %v1311_v28, %v1310_v27 }
 0x439   : > { %v1313_v30 = vrot.slane %v1312_v29, 1 }
 0x43b   : > { %v1314_v31 = vadd.f32 %v1313_v30, %v1312_v29 }
 0x43d   : > { %1613 = vpush %v1314_v31 }
 0x46e   : > { %s1614_s27 = spop %1613 }
 0x46f   : > { %v1316_v32 = vstv %s1614_s27 }
 0x470   : > { %1317 = vst [vmem:[%s352_s22] sm:$0x1] %v1316_v32 }
 0x471   : > { %1682 = shalt.err (!%p1679_p3)
}
 0x472   : > { %s1683_s25 = scalar_lea.hbm %s1994_s29, 16  ;;  %s1687_s27 = scalar_lea.hbm %s2043_s9, 32 }
 0x473   : > { %p1684_p4 = scmp.ne.s32.totalorder %s1994_s29, %s1683_s25  ;;  %p1688_p9 = scmp.lt.u32.totalorder %s1994_s29, %s2043_s9 }
 0x474   : > { %p1689_p10 = scmp.lt.u32.totalorder %s1687_s27, %s1683_s25  ;;  %p1691_p12 = scmp.lt.u32.totalorder %s1683_s25, %s1994_s29 }
 0x475   : > { %p1685_p7 = pnand %p1684_p4, %p1825_p5 }
 0x476   : > { %p1690_p11 = por %p1689_p10, %p1688_p9 }
 0x477   : > { %p1686_p8 = pneg %p1685_p7 }
 0x478   : > { %p1692_p13 = por %p1691_p12, %p1690_p11 }
 0x47a   : > { %p1693_p0 = pnand %p1692_p13, %p1686_p8 }
 0x47c   : > { %1696 = shalt.err (!%p1693_p0)
}
 0x47d   : > { %1615 = dma.vmem_to_hbm [thread:$0]  (%p1825_p5), %s1989_s23, 16, %s1994_s29, %s1319_s14  }
 0x47e PF: > { %p1621_p1 = scmp.ge.s32.totalorder %s1731_s12, 2  ;;  %s1343_s16 = sand.u32 1, %s1719_s30  }
 0x47f   : > { %s1344_s13 = scalar_lea.sflag [#allocation3], %s1343_s16 }
 0x480   : > { %p1618_p2 = pnand %p1621_p1, %p1829_p6 }
 0x482   : > { %1714 = dma.done.wait (!%p1618_p2), %s1344_s13, 16  }
 0x483   : > { %1716 = vsyncadd (!%p1618_p2), %s1344_s13, 4294967280  ;;  %p19_p3 = scmp.ge.s32.totalorder %s1812_s15, 4   ;;  %s2046_s30 = smov %s1723_s10 }
 0x484   : > { %s2047_s10 = smov %s1727_s11  ;;  %s2048_s11 = smov %s1823_s18 }
 0x485   : > { %s2049_s12 = smov %s1812_s15  ;;  %21 = sbr.rel (!%p19_p3) target bundleno = 3 (0x3), region = 97 }
 0x48c   :  { %1348 = vsyncpa [#allocation3], 1 }
 0x48d   :  { %1350 = vsyncpa [#allocation3 + $0x1], 1 }

</bundles_post_ra>
